<compile_context>
chip_gen: v6e
topology: v6e:2x2x1
jax: 0.10.0
libtpu: 0.0.40
codegen_flags: <defaults>
</compile_context>

<pallas_src>
import jax
import jax.numpy as jnp
from jax.experimental import pallas as pl
from jax.experimental.pallas import tpu as pltpu

# ----------------------------- dimensions ----------------------------------
TM       = 128             # batch tile per grid step (128 for v5e; 256 on v6e/v7x)
IN_F     = 256             # flattened input features (small stand-in for 784)
H1       = 256             # hidden width of the pretrained extractor
FEAT     = 128             # feature dim (fixed by fc_new = Linear(128, 10))
OUT      = 10              # number of Fashion-MNIST classes
OUT_PAD  = 128             # lane-dense padded output width

W_ROWS   = IN_F + H1 + FEAT        # 640 rows in the packed weight blob
W_COLS   = 256                     # max(H1, FEAT, OUT_PAD)
B_STRIDE = 8                       # 8-sublane-aligned row per bias in the blob
B_ROWS   = 3 * B_STRIDE            # 24


# ------------------------------ kernel --------------------------------------
def fmnist_kernel(x_ref, w_ref, b_ref, o_ref):
    # w_ref / b_ref have constant index_maps -> DMA'd once, resident in VMEM
    # for every grid step.  Static .at-style slices below are free ref views.
    w1 = w_ref[0:IN_F, 0:H1]                       # (IN_F, H1)      bf16
    w2 = w_ref[IN_F:IN_F + H1, 0:FEAT]             # (H1, FEAT)      bf16
    w3 = w_ref[IN_F + H1:W_ROWS, 0:OUT_PAD]        # (FEAT, OUT_PAD) bf16
    b1 = b_ref[0:1, 0:H1]                          # (1, H1)         f32
    b2 = b_ref[B_STRIDE:B_STRIDE + 1, 0:FEAT]      # (1, FEAT)       f32
    b3 = b_ref[2 * B_STRIDE:2 * B_STRIDE + 1, 0:OUT_PAD]  # (1, OUT_PAD) f32

    # feature_extractor: Linear(IN_F, H1) -> ReLU -> Linear(H1, FEAT)
    # Activations are cast to bf16 only for the MXU feed; bias adds, ReLU and
    # accumulation stay f32 (v5e has no bf16 VPU/EUP).
    x_bf = x_ref[...].astype(jnp.bfloat16)
    h1 = jnp.dot(x_bf, w1, preferred_element_type=jnp.float32)
    h1 = jnp.maximum(h1 + b1, 0.0)

    feats = jnp.dot(h1.astype(jnp.bfloat16), w2, preferred_element_type=jnp.float32)
    feats = jnp.maximum(feats + b2, 0.0)           # F.relu(x) in forward()

    # fc_new: Linear(FEAT, OUT), zero-padded to OUT_PAD lanes (lane-dense vst)
    out = jnp.dot(feats.astype(jnp.bfloat16), w3, preferred_element_type=jnp.float32)
    o_ref[...] = out + b3


# -------------------------- one-time param prep ------------------------------
def prepare_params(params):
    """One-time conversion from PyTorch (out, in) layout to kernel layout.

    Done at init so no transposes / casts / padding / packing happen per call:
      * transpose to (in_features, out_features), cast weights to bf16
      * pack w1/w2/w3 into ONE bf16 blob, b1/b2/b3 into ONE f32 blob
        (3 input DMAs per call instead of 7)
      * zero-pad fc_new from 10 to 128 output columns (lane-dense output)
    """
    wblob = jnp.zeros((W_ROWS, W_COLS), jnp.bfloat16)
    wblob = wblob.at[0:IN_F, 0:H1].set(params["w1"].T.astype(jnp.bfloat16))
    wblob = wblob.at[IN_F:IN_F + H1, 0:FEAT].set(params["w2"].T.astype(jnp.bfloat16))
    wblob = wblob.at[IN_F + H1:W_ROWS, 0:OUT].set(params["w3"].T.astype(jnp.bfloat16))

    bblob = jnp.zeros((B_ROWS, W_COLS), jnp.float32)
    bblob = bblob.at[0, 0:H1].set(params["b1"].astype(jnp.float32))
    bblob = bblob.at[B_STRIDE, 0:FEAT].set(params["b2"].astype(jnp.float32))
    bblob = bblob.at[2 * B_STRIDE, 0:OUT].set(params["b3"].astype(jnp.float32))

    return {"w": wblob, "b": bblob}


# ------------------------------ wrapper --------------------------------------
@jax.jit
def fashion_mnist_forward(x, prepared):
    """x: (B, IN_F) float32, B a multiple of TM.  prepared: prepare_params().

    Returns the lane-dense padded logits (B, OUT_PAD); columns [OUT:] are
    exactly zero.  Consume the padded buffer downstream (or fuse argmax into
    the kernel epilogue) instead of slicing — a wrapper-side slice is a
    separate XLA op comparable in cost to the whole pallas_call at this size.
    """
    B = x.shape[0]
    assert B % TM == 0, f"batch {B} must be a multiple of TM={TM}"
    n_tiles = B // TM
    wblob, bblob = prepared["w"], prepared["b"]

    cost = pl.CostEstimate(
        # Kernel really computes all OUT_PAD=128 padded columns on the MXU.
        flops=2 * B * (IN_F * H1 + H1 * FEAT + FEAT * OUT_PAD),
        transcendentals=0,
        bytes_accessed=(int(x.size) * 4 + int(wblob.size) * 2
                        + int(bblob.size) * 4 + B * OUT_PAD * 4),
    )

    return pl.pallas_call(
        fmnist_kernel,
        out_shape=jax.ShapeDtypeStruct((B, OUT_PAD), jnp.float32),
        grid=(n_tiles,),
        in_specs=[
            pl.BlockSpec((TM, IN_F), lambda i: (i, 0)),          # batch tile
            pl.BlockSpec((W_ROWS, W_COLS), lambda i: (0, 0)),    # weights, resident
            pl.BlockSpec((B_ROWS, W_COLS), lambda i: (0, 0)),    # biases, resident
        ],
        out_specs=pl.BlockSpec((TM, OUT_PAD), lambda i: (i, 0)),
        compiler_params=pltpu.CompilerParams(
            dimension_semantics=("parallel",),   # v7x: shard batch grid across 2 TCs
            vmem_limit_bytes=4 << 20,
        ),
        cost_estimate=cost,
    )(x, wblob, bblob)


# --------------------------- pure-JAX reference ------------------------------
def reference_forward(x, params):
    """Mirrors the kernel numerics: bf16 weights AND bf16 activation feeds to
    every matmul, f32 accumulation / bias / ReLU."""
    def bf16_mm(a, w_pt):                       # w_pt is PyTorch (out, in) layout
        a16 = a.astype(jnp.bfloat16).astype(jnp.float32)
        w16 = w_pt.T.astype(jnp.bfloat16).astype(jnp.float32)
        return a16 @ w16
    h1 = jnp.maximum(bf16_mm(x, params["w1"]) + params["b1"], 0.0)
    feats = jnp.maximum(bf16_mm(h1, params["w2"]) + params["b2"], 0.0)
    return bf16_mm(feats, params["w3"]) + params["b3"]


# ------------------------------- main ----------------------------------------
if __name__ == "__main__":
    key = jax.random.PRNGKey(0)
    kx, k1, k2, k3, k4, k5, k6 = jax.random.split(key, 7)

    BATCH = 2 * TM                               # 256 rows = 2 grid tiles
    x = jax.random.normal(kx, (BATCH, IN_F), dtype=jnp.float32)

    # Deterministic synthetic "pretrained" weights (PyTorch (out, in) layout).
    params = {
        "w1": jax.random.normal(k1, (H1, IN_F), dtype=jnp.float32) * 0.05,
        "b1": jax.random.normal(k2, (H1,), dtype=jnp.float32) * 0.05,
        "w2": jax.random.normal(k3, (FEAT, H1), dtype=jnp.float32) * 0.05,
        "b2": jax.random.normal(k4, (FEAT,), dtype=jnp.float32) * 0.05,
        "w3": jax.random.normal(k5, (OUT, FEAT), dtype=jnp.float32) * 0.05,
        "b3": jax.random.normal(k6, (OUT,), dtype=jnp.float32) * 0.05,
    }

    prepared = prepare_params(params)            # init-time: pack/transpose/cast once

    out_pad = fashion_mnist_forward(x, prepared)
    out_pad = jax.block_until_ready(out_pad)

    # Correctness check only — serving code consumes the padded buffer directly.
    out = out_pad[:, :OUT]
    ref = reference_forward(x, params)

    assert out_pad.shape == (BATCH, OUT_PAD), out_pad.shape
    assert out.shape == (BATCH, OUT), out.shape
    assert jnp.allclose(out_pad[:, OUT:], 0.0), "padded lanes must be zero"
    assert jnp.allclose(out, ref, atol=1e-2, rtol=1e-2), "mismatch vs reference"

    print("KERNEL_OK")
</pallas_src>

<mosaic_0001>
module attributes {stable_mosaic.version = 11 : i64} {
  func.func @fmnist_kernel(%arg0: i32, %arg1: memref<128x256xf32, #tpu.memory_space<vmem>>, %arg2: memref<640x256xbf16, #tpu.memory_space<vmem>>, %arg3: memref<24x256xf32, #tpu.memory_space<vmem>>, %arg4: memref<128x128xf32, #tpu.memory_space<vmem>>) attributes {dimension_semantics = [#tpu.dimension_semantics<parallel>], iteration_bounds = array<i64: 2>, scalar_prefetch = 0 : i64, scratch_operands = 0 : i64, tpu.core_type = #tpu.core_type<tc>, window_params = [{transform_indices = @transform_0, window_bounds = array<i64: 128, 256>}, {pipeline_mode = #tpu.pipeline_mode<synchronous>, transform_indices = @transform_1, window_bounds = array<i64: 640, 256>}, {pipeline_mode = #tpu.pipeline_mode<synchronous>, transform_indices = @transform_2, window_bounds = array<i64: 24, 256>}, {transform_indices = @transform_3, window_bounds = array<i64: 128, 128>}]} {
    %c0 = arith.constant 0 : index
    %c0_0 = arith.constant 0 : index
    %0 = vector.load %arg2[%c0, %c0_0] : memref<640x256xbf16, #tpu.memory_space<vmem>>, vector<256x256xbf16>
    %c256 = arith.constant 256 : index
    %c0_1 = arith.constant 0 : index
    %1 = vector.load %arg2[%c256, %c0_1] : memref<640x256xbf16, #tpu.memory_space<vmem>>, vector<256x128xbf16>
    %c512 = arith.constant 512 : index
    %c0_2 = arith.constant 0 : index
    %2 = vector.load %arg2[%c512, %c0_2] : memref<640x256xbf16, #tpu.memory_space<vmem>>, vector<128x128xbf16>
    %c0_3 = arith.constant 0 : index
    %c0_4 = arith.constant 0 : index
    %3 = vector.load %arg3[%c0_3, %c0_4] : memref<24x256xf32, #tpu.memory_space<vmem>>, vector<1x256xf32>
    %c8 = arith.constant 8 : index
    %c0_5 = arith.constant 0 : index
    %4 = vector.load %arg3[%c8, %c0_5] : memref<24x256xf32, #tpu.memory_space<vmem>>, vector<1x128xf32>
    %c16 = arith.constant 16 : index
    %c0_6 = arith.constant 0 : index
    %5 = vector.load %arg3[%c16, %c0_6] : memref<24x256xf32, #tpu.memory_space<vmem>>, vector<1x128xf32>
    %c0_7 = arith.constant 0 : index
    %c0_8 = arith.constant 0 : index
    %6 = vector.load %arg1[%c0_7, %c0_8] : memref<128x256xf32, #tpu.memory_space<vmem>>, vector<128x256xf32>
    %7 = arith.truncf %6 : vector<128x256xf32> to vector<128x256xbf16>
    %cst = arith.constant dense<0.000000e+00> : vector<128x256xf32>
    %8 = tpu.matmul %7, %0, %cst {dimension_numbers = #tpu.dot_dimension_numbers<[1], [0], [0], [1], [0, 0, 1, 1], [], []>} : vector<128x256xbf16>, vector<256x256xbf16>, vector<128x256xf32> -> vector<128x256xf32>
    %9 = vector.broadcast %3 : vector<1x256xf32> to vector<128x256xf32>
    %10 = arith.addf %8, %9 : vector<128x256xf32>
    %cst_9 = arith.constant 0.000000e+00 : f32
    %11 = vector.broadcast %cst_9 : f32 to vector<128x256xf32>
    %12 = arith.maximumf %10, %11 : vector<128x256xf32>
    %13 = arith.truncf %12 : vector<128x256xf32> to vector<128x256xbf16>
    %cst_10 = arith.constant dense<0.000000e+00> : vector<128x128xf32>
    %14 = tpu.matmul %13, %1, %cst_10 {dimension_numbers = #tpu.dot_dimension_numbers<[1], [0], [0], [1], [0, 0, 1, 1], [], []>} : vector<128x256xbf16>, vector<256x128xbf16>, vector<128x128xf32> -> vector<128x128xf32>
    %15 = vector.broadcast %4 : vector<1x128xf32> to vector<128x128xf32>
    %16 = arith.addf %14, %15 : vector<128x128xf32>
    %cst_11 = arith.constant 0.000000e+00 : f32
    %17 = vector.broadcast %cst_11 : f32 to vector<128x128xf32>
    %18 = arith.maximumf %16, %17 : vector<128x128xf32>
    %19 = arith.truncf %18 : vector<128x128xf32> to vector<128x128xbf16>
    %cst_12 = arith.constant dense<0.000000e+00> : vector<128x128xf32>
    %20 = tpu.matmul %19, %2, %cst_12 {dimension_numbers = #tpu.dot_dimension_numbers<[1], [0], [0], [1], [0, 0, 1, 1], [], []>} : vector<128x128xbf16>, vector<128x128xbf16>, vector<128x128xf32> -> vector<128x128xf32>
    %21 = vector.broadcast %5 : vector<1x128xf32> to vector<128x128xf32>
    %22 = arith.addf %20, %21 : vector<128x128xf32>
    %c0_13 = arith.constant 0 : index
    %c0_14 = arith.constant 0 : index
    %23 = vector.load %arg4[%c0_13, %c0_14] : memref<128x128xf32, #tpu.memory_space<vmem>>, vector<128x128xf32>
    tpu.vector_store %arg4[%c0_13, %c0_14], %22 {strides = array<i32>} : memref<128x128xf32, #tpu.memory_space<vmem>>, vector<128x128xf32>,
    return
  }
  func.func @transform_0(%arg0: i32) -> (i32, i32) {
    %c0_i32 = arith.constant 0 : i32
    %c0_i32_0 = arith.constant 0 : i32
    return %arg0, %c0_i32 : i32, i32
  }
  func.func @transform_1(%arg0: i32) -> (i32, i32) {
    %c0_i32 = arith.constant 0 : i32
    %c0_i32_0 = arith.constant 0 : i32
    %c0_i32_1 = arith.constant 0 : i32
    return %c0_i32, %c0_i32_0 : i32, i32
  }
  func.func @transform_2(%arg0: i32) -> (i32, i32) {
    %c0_i32 = arith.constant 0 : i32
    %c0_i32_0 = arith.constant 0 : i32
    %c0_i32_1 = arith.constant 0 : i32
    return %c0_i32, %c0_i32_0 : i32, i32
  }
  func.func @transform_3(%arg0: i32) -> (i32, i32) {
    %c0_i32 = arith.constant 0 : i32
    %c0_i32_0 = arith.constant 0 : i32
    return %arg0, %c0_i32 : i32, i32
  }
}

</mosaic_0001>

<bundles_post_ra>
// kernel: fashion_mnist_forward.1
= control target key start
LH: loop header
LB: loop body
LE: loop exit
PB: predicated region body
PF: predicated region fallthrough
CT: control target
= control target key end

     0   :  { %8 = vsyncpa [#allocation3], 0  ;;  %s1986_s0 = inlined_call_operand.hbm [shape: f32[256,256], index: 0, kind: input, shape index: {}]   ;;  %s1987_s1 = inlined_call_operand.hbm [shape: bf16[640,256], index: 1, kind: input, shape index: {}]   ;;  %s1988_s2 = inlined_call_operand.hbm [shape: f32[24,256], index: 2, kind: input, shape index: {}]   ;;  %s1989_s3 = inlined_call_operand.hbm [shape: f32[256,128], index: 3, kind: output, shape index: {}]  }
   0x1   :  { %10 = vsyncpa [#allocation3 + $0x1], 0 }
   0x2   :  { %11 = vsyncpa [#allocation6], 0 }
   0x3   :  { %12 = vsyncpa [#allocation4], 0 }
   0x4   :  { %14 = vsyncpa [#allocation4 + $0x1], 0  ;;  %s1684_s12 = smov 0   ;;  %s1686_s13 = smov 0  }
   0x5   :  { %s1688_s14 = smov 0   ;;  %s1690_s15 = smov 0  }
   0x6 LB: > { %s1705_s16 = sadd.s32 4294967295, %s1652_s15   ;;  %s1169_s17 = sadd.s32 4294967294, %s1652_s15   ;;  %s1652_s15 = sphi %s1690_s15, %s2011_s15   ;;  %s1648_s14 = sphi %s1688_s14, %s2010_s14   ;;  %s1644_s13 = sphi %s1686_s13, %s2009_s13   ;;  %s1640_s12 = sphi %s1684_s12, %s2008_s12  }
   0x7   : > { %p40_p0 = scmp.ne.s32.totalorder %s1644_s13, %s1640_s12  ;;  %p1990_p1 = scmp.eq.s32.totalorder %s1705_s16, 0 }
   0x8   : > { %p112_p3 = scmp.eq.s32.totalorder %s1169_s17, 1  ;;  %p1170_p5 = scmp.ge.s32.totalorder %s1652_s15, 1 }
   0x9   : > { %p1714_p4 = por %p1990_p1, %p40_p0  ;;  %p119_p7 = scmp.lt.s32.totalorder %s1652_s15, 3 }
   0xa   : > { %p1719_p6 = por %p112_p3, %p40_p0  ;;  %s1654_s21 = smov [#allocation5]  }
   0xb   : > { %s1994_s18 = scalar_select %p1714_p4, 1, 0 }
   0xc   : > { %s1995_s19 = scalar_select %p1719_p6, 1, 0 }
   0xd   : > { %p1724_p8 = pnand %p1170_p5, %p119_p7  ;;  %s131_s22 = sshll.u32 %s1654_s21, 4  ;;  %s132_s22 = int_to_ptr.vmem [resolvable:$true] %s131_s22 }
   0xe   : > { %s1655_s24 = smov [#allocation7]   ;;  %s1515_s26 = scalar_lea.vmem %s132_s22, 10240 }
   0xf   : > { %s1996_s20 = scalar_select %p1724_p8, 1, 0 }
  0x10   : > { %p1371_p9 = pneg %p1724_p8  ;;  %s144_s25 = sshll.u32 %s1655_s24, 4  ;;  %s145_s25 = int_to_ptr.vmem [resolvable:$true] %s144_s25 }
  0x11   : > { %p1516_p13 = scmp.ne.s32.totalorder %s132_s22, %s1515_s26  ;;  %p1523_p5 = scmp.lt.s32.totalorder %s132_s22, %s132_s22 }
  0x12   : > { %p1733_p11 = pnand %p1371_p9, %p1990_p1  ;;  %p1524_p7 = scmp.lt.s32.totalorder %s1515_s26, %s1515_s26 }
  0x14   : > { %p1506_p12 = pneg %p1733_p11  ;;  %p1525_p10 = por %p1524_p7, %p1523_p5 }
  0x16   : > { %p1518_p0 = pnand %p1516_p13, %p1506_p12 }
  0x18   : > { %p1519_p3 = pneg %p1518_p0 }
  0x1a   : > { %p1526_p9 = pnand %p1525_p10, %p1519_p3 }
  0x1c   : > { %1529 = shalt.err (!%p1526_p9)
}
  0x1d   : > { %s1656_s27 = smov 128   ;;  %s1657_s28 = smov 8  }
  0x1e   : > { %1374 = dma.hbm_to_vmem [thread:$0]  (!%p1733_p11), %s1987_s1, 10240, %s132_s22, [#allocation6], %s1656_s27, %s1656_s27, %s1657_s28  }
  0x1f   : > { %s1541_s4 = scalar_lea.vmem %s145_s25, 768  ;;  %p1549_p2 = scmp.lt.s32.totalorder %s145_s25, %s145_s25 }
  0x20   : > { %p1542_p1 = scmp.ne.s32.totalorder %s145_s25, %s1541_s4  ;;  %p1550_p6 = scmp.lt.s32.totalorder %s1541_s4, %s1541_s4 }
  0x22   : > { %p1544_p13 = pnand %p1542_p1, %p1506_p12  ;;  %p1551_p5 = por %p1550_p6, %p1549_p2 }
  0x24   : > { %p1545_p0 = pneg %p1544_p13 }
  0x26   : > { %p1552_p10 = pnand %p1551_p5, %p1545_p0 }
  0x28   : > { %1555 = shalt.err (!%p1552_p10)
}
  0x29   : > { %s1658_s5 = smov 256   ;;  %s1659_s6 = smov 16  }
  0x2a   : > { %1377 = dma.hbm_to_vmem [thread:$0]  (!%p1733_p11), %s1988_s2, 768, %s145_s25, [#allocation6], %s1658_s5, %s1658_s5, %s1659_s6  }
  0x2b   : > { %s1759_s9 = sadd.s32 1, %s1652_s15   ;;  %s27_s11 = sadd.s32 1, %s1648_s14 }
  0x2c   : > { %s24_s10 = ssub.s32 %s1652_s15, %s1759_s9  ;;  %p34_p2 = scmp.ne.s32.totalorder %s1648_s14, %s1644_s13 }
  0x2d   : > { %p25_p1 = scmp.eq.s32.totalorder %s24_s10, 0  ;;  %p35_p6 = scmp.eq.s32.totalorder %s1652_s15, 0 }
  0x2e   : > { %p1998_p3 = scmp.eq.s32.totalorder %s1705_s16, 1  ;;  %p1388_p9 = scmp.lt.s32.totalorder %s1652_s15, 2 }
  0x2f   : > { %s1768_s17 = scalar_select %p25_p1, %s1648_s14, %s27_s11  }
  0x30   : > { %p36_p12 = por %p35_p6, %p34_p2  ;;  %p1772_p7 = por %p1998_p3, %p34_p2 }
  0x31   : > { %s158_s22 = sand.u32 1, %s1648_s14   ;;  %s1245_s24 = sshll.u32 %s1652_s15, 12 }
  0x32   : > { %s1999_s21 = scalar_select %p1772_p7, 1, 0 }
  0x33   : > { %s1174_s23 = sshll.u32 %s158_s22, 8  ;;  %s1782_s27 = scalar_lea.hbm %s1986_s0, %s1245_s24 }
  0x34   : > { %s162_s28 = scalar_lea.vmem [#allocation2], %s1174_s23  ;;  %p1786_p11 = pnand %p1388_p9, %p36_p12 }
  0x35   : > { %s170_s29 = sshll.u32 %s162_s28, 4  ;;  %s1790_s4 = scalar_lea.sflag [#allocation3], %s158_s22  ;;  %s1784_s29 = int_to_ptr.vmem [resolvable:$true] %s170_s29 }
  0x36   : > { %s1556_s7 = scalar_lea.hbm %s1782_s27, 4096  ;;  %p1558_p0 = pneg %p1786_p11 }
  0x37   : > { %p1557_p13 = scmp.ne.s32.totalorder %s1782_s27, %s1556_s7  ;;  %s1561_s11 = scalar_lea.hbm %s1986_s0, 8192 }
  0x38   : > { %p1562_p1 = scmp.lt.s32.totalorder %s1782_s27, %s1986_s0  ;;  %p1563_p2 = scmp.lt.s32.totalorder %s1561_s11, %s1556_s7 }
  0x39   : > { %p1559_p5 = pnand %p1558_p0, %p1557_p13 }
  0x3a   : > { %p1564_p6 = por %p1563_p2, %p1562_p1 }
  0x3b   : > { %p1560_p10 = pneg %p1559_p5 }
  0x3d   : > { %p1565_p12 = pnand %p1564_p6, %p1560_p10 }
  0x3f   : > { %1568 = shalt.err (!%p1565_p12)
}
  0x40   : > { %s1569_s22 = scalar_lea.vmem %s1784_s29, 4096  ;;  %s1660_s25 = smov [#allocation2]  }
  0x41   : > { %p1570_p3 = scmp.ne.s32.totalorder %s1784_s29, %s1569_s22  ;;  %s1574_s26 = sshll.u32 %s1660_s25, 4  ;;  %s1575_s26 = int_to_ptr.vmem [resolvable:$false] %s1574_s26 }
  0x42   : > { %s1576_s28 = scalar_lea.vmem %s1575_s26, 8192  ;;  %p1577_p5 = scmp.lt.s32.totalorder %s1784_s29, %s1575_s26 }
  0x43   : > { %p1572_p9 = pnand %p1570_p3, %p1558_p0  ;;  %p1578_p7 = scmp.lt.s32.totalorder %s1576_s28, %s1569_s22 }
  0x45   : > { %p1573_p13 = pneg %p1572_p9  ;;  %p1579_p4 = por %p1578_p7, %p1577_p5 }
  0x47   : > { %p1580_p8 = pnand %p1579_p4, %p1573_p13 }
  0x49   : > { %1583 = shalt.err (!%p1580_p8)
}
  0x4a   : > { %1381 = dma.hbm_to_vmem [thread:$0]  (!%p1786_p11), %s1782_s27, 4096, %s1784_s29, %s1790_s4, %s1658_s5, %s1658_s5, %s1659_s6  }
  0x4b   : > { %p2001_p0 = scmp.ne.s32.totalorder %s1996_s20, 0 }
  0x4c   : > { %s1817_s7 = sand.u32 (!%p2001_p0), 1, %s1644_s13   ;;  %p2002_p4 = scmp.ne.s32.totalorder (!%p2001_p0), %s1994_s18, 0 }
  0x4d   : > { %182 = sbr.rel (%p2001_p0) target bundleno = 835 (0x343), region = 32  ;;  %s1179_s8 = sshll.u32 (!%p2001_p0), %s1817_s7, 8 }
  0x4e   : > { %s185_s10 = scalar_lea.sflag (!%p2001_p0), [#allocation3], %s1817_s7  ;;  %s1821_s11 = scalar_lea.vmem (!%p2001_p0), [#allocation2], %s1179_s8 }
  0x52   : > { %1627 = dma.done.wait (%p2002_p4), %s185_s10, 4096  }
  0x53   : > { %1629 = vsyncadd (%p2002_p4), %s185_s10, 4294963200  ;;  %p2003_p8 = scmp.eq.s32.totalorder %s1705_s16, 0 }
  0x55   : > { %1631 = dma.done.wait (%p2003_p8), [#allocation6], 11008   ;;  %p2004_p7 = pmov %p2003_p8 }
  0x56   : > { %v1432_v0 = vld [vmem:[#allocation5 + $0x74] ss:$8 sps:$4 sm:$0xff]   ;;  %v1434_v1 = vld [vmem:[#allocation5 + $0x70] ss:$8 sps:$4 sm:$0xff]   ;;  %v1435_v2 = vld [vmem:[#allocation5 + $0x64] ss:$8 sps:$4 sm:$0xff]  }
  0x57   : > { %1633 = vsyncadd (%p2004_p7), [#allocation6], 4294956288  ;;  %524 = vmatprep.subr.bf16.mxu0 %v1432_v0  ;;  %v1437_v3 = vld [vmem:[#allocation5 + $0x60] ss:$8 sps:$4 sm:$0xff]   ;;  %v1438_v4 = vld [vmem:[#allocation5 + $0x54] ss:$8 sps:$4 sm:$0xff]  }
  0x58   : > { %525 = vmatpush1.bf16.msra.mxu0 %v1434_v1  ;;  %v1440_v5 = vld [vmem:[#allocation5 + $0x50] ss:$8 sps:$4 sm:$0xff]   ;;  %v1441_v6 = vld [vmem:[#allocation5 + $0x44] ss:$8 sps:$4 sm:$0xff]   ;;  %v1443_v7 = vld [vmem:[#allocation5 + $0x40] ss:$8 sps:$4 sm:$0xff]  }
  0x59   : > { %526 = vmatprep.subr.bf16.mxu0 %v1435_v2  ;;  %v1444_v8 = vld [vmem:[#allocation5 + $0x34] ss:$8 sps:$4 sm:$0xff]   ;;  %v1446_v9 = vld [vmem:[#allocation5 + $0x30] ss:$8 sps:$4 sm:$0xff]   ;;  %v1447_v10 = vld [vmem:[#allocation5 + $0x24] ss:$8 sps:$4 sm:$0xff]  }
  0x5a   : > { %v1449_v11 = vld [vmem:[#allocation5 + $0x20] ss:$8 sps:$4 sm:$0xff]   ;;  %v1450_v12 = vld [vmem:[#allocation5 + $0x14] ss:$8 sps:$4 sm:$0xff]   ;;  %v1452_v16 = vld [vmem:[#allocation5 + $0x10] ss:$8 sps:$4 sm:$0xff]  }
  0x5b   : > { %v306_v13 = vld [vmem:[%s1821_s11 + $0x8] sm:$0xff]  ;;  %v308_v14 = vld [vmem:[%s1821_s11 + $0x18] sm:$0xff]  ;;  %v305_v45 = vld [vmem:[%s1821_s11] sm:$0xff]  ;;  %s1182_s18 = sshll.u32 %s1817_s7, 7  ;;  %s1246_s5 = sshll.u32 %s1705_s16, 11 }
  0x5c   : > { %527 = vmatpush1.bf16.msra.mxu0 %v1437_v3  ;;  %v338_v15 = vpack.c.bf16 %v308_v14, %v306_v13  ;;  %v1453_v17 = vld [vmem:[#allocation5 + $0x4] ss:$8 sps:$4 sm:$0xff]   ;;  %v1455_v18 = vld [vmem:[#allocation5] ss:$8 sps:$4 sm:$0xff]   ;;  %v1456_v19 = vld [vmem:[#allocation5 + $0xf4] ss:$8 sps:$4 sm:$0xff]   ;;  %s1939_s30 = scalar_lea.hbm %s1989_s3, %s1246_s5 }
  0x5d   : > { %528 = vmatprep.subr.bf16.mxu0 %v1438_v4  ;;  %v1458_v20 = vld [vmem:[#allocation5 + $0xf0] ss:$8 sps:$4 sm:$0xff]   ;;  %v1459_v21 = vld [vmem:[#allocation5 + $0xe4] ss:$8 sps:$4 sm:$0xff]   ;;  %v1461_v23 = vld [vmem:[#allocation5 + $0xe0] ss:$8 sps:$4 sm:$0xff]  }
  0x5e   : > { %556 = vmatprep.mubr.bf16.mxu0 %v338_v15  ;;  %v1480_v22 = vld [vmem:[#allocation5 + $0x1f0] ss:$8 sps:$4 sm:$0xff]   ;;  %v1462_v25 = vld [vmem:[#allocation5 + $0xd4] ss:$8 sps:$4 sm:$0xff]   ;;  %v1482_v26 = vld [vmem:[#allocation5 + $0x1e0] ss:$8 sps:$4 sm:$0xff]  }
  0x5f   : > { %v1481_v24 = vld [vmem:[#allocation5 + $0x170] ss:$8 sps:$4 sm:$0xff]   ;;  %1247 = vmatprep.subr.bf16.mxu1 %v1480_v22  ;;  %v1483_v27 = vld [vmem:[#allocation5 + $0x160] ss:$8 sps:$4 sm:$0xff]   ;;  %v1465_v30 = vld [vmem:[#allocation5 + $0xc4] ss:$8 sps:$4 sm:$0xff]  }
  0x60   : > { %529 = vmatpush1.bf16.msra.mxu0 %v1440_v5  ;;  %1248 = vmatpush3.bf16.msra.mxu1 %v1481_v24  ;;  %v1484_v28 = vld [vmem:[#allocation5 + $0x1d0] ss:$8 sps:$4 sm:$0xff]   ;;  %v1486_v32 = vld [vmem:[#allocation5 + $0x1c0] ss:$8 sps:$4 sm:$0xff]   ;;  %v1468_v34 = vld [vmem:[#allocation5 + $0xb4] ss:$8 sps:$4 sm:$0xff]  }
  0x61   : > { %530 = vmatprep.subr.bf16.mxu0 %v1441_v6  ;;  %1249 = vmatprep.subr.bf16.mxu1 %v1482_v26  ;;  %v1464_v29 = vld [vmem:[#allocation5 + $0xd0] ss:$8 sps:$4 sm:$0xff]   ;;  %v1467_v33 = vld [vmem:[#allocation5 + $0xc0] ss:$8 sps:$4 sm:$0xff]   ;;  %v1471_v39 = vld [vmem:[#allocation5 + $0xa4] ss:$8 sps:$4 sm:$0xff]  }
  0x62   : > { %v1485_v31 = vld [vmem:[#allocation5 + $0x150] ss:$8 sps:$4 sm:$0xff]   ;;  %v1487_v35 = vld [vmem:[#allocation5 + $0x140] ss:$8 sps:$4 sm:$0xff]   ;;  %v1474_v41 = vld [vmem:[#allocation5 + $0x94] ss:$8 sps:$4 sm:$0xff]  }
  0x63   : > { %v1488_v36 = vld [vmem:[#allocation5 + $0x1b0] ss:$8 sps:$4 sm:$0xff]   ;;  %v1473_v40 = vld [vmem:[#allocation5 + $0xa0] ss:$8 sps:$4 sm:$0xff]   ;;  %v1477_v43 = vld [vmem:[#allocation5 + $0x84] ss:$8 sps:$4 sm:$0xff]  }
  0x64   : > { %531 = vmatpush1.bf16.msra.mxu0 %v1443_v7  ;;  %1250 = vmatpush3.bf16.msra.mxu1 %v1483_v27  ;;  %v1470_v37 = vld [vmem:[#allocation5 + $0xb0] ss:$8 sps:$4 sm:$0xff]   ;;  %v1479_v44 = vld [vmem:[#allocation5 + $0x80] ss:$8 sps:$4 sm:$0xff]   ;;  %s1918_s20 = scalar_lea.vmem [#allocation8], %s1182_s18  ;;  %s1064_s4 = scalar_lea.sflag [#allocation4], %s1817_s7 }
  0x65   : > { %532 = vmatprep.subr.bf16.mxu0 %v1444_v8  ;;  %1251 = vmatprep.subr.bf16.mxu1 %v1484_v28  ;;  %v1489_v38 = vld [vmem:[#allocation5 + $0x130] ss:$8 sps:$4 sm:$0xff]   ;;  %v310_v47 = vld [vmem:[%s1821_s11 + $0x28] sm:$0xff]  ;;  %v309_v51 = vld [vmem:[%s1821_s11 + $0x20] sm:$0xff]  ;;  %s1077_s6 = sshll.u32 %s1918_s20, 4  ;;  %p2005_p10 = scmp.ne.s32.totalorder %s1999_s21, 0  ;;  %s1941_s6 = int_to_ptr.vmem [resolvable:$true] %s1077_s6 }
  0x66   : > { %v1476_v42 = vld [vmem:[#allocation5 + $0x90] ss:$8 sps:$4 sm:$0xff]   ;;  %v314_v53 = vld [vmem:[%s1821_s11 + $0x48] sm:$0xff]  ;;  %v313_v57 = vld [vmem:[%s1821_s11 + $0x40] sm:$0xff]  ;;  %s1584_s16 = scalar_lea.vmem %s1941_s6, 2048  ;;  %s1661_s23 = smov [#allocation8]  }
  0x67   : > { %v307_v46 = vld [vmem:[%s1821_s11 + $0x10] sm:$0xff]  ;;  %v312_v48 = vld [vmem:[%s1821_s11 + $0x38] sm:$0xff]  ;;  %v318_v59 = vld [vmem:[%s1821_s11 + $0x68] sm:$0xff]  ;;  %p1585_p11 = scmp.ne.s32.totalorder %s1941_s6, %s1584_s16  ;;  %s1588_s24 = sshll.u32 %s1661_s23, 4  ;;  %s1589_s24 = int_to_ptr.vmem [resolvable:$false] %s1588_s24 }
  0x68   : > { %533 = vmatpush1.bf16.msra.mxu0 %v1446_v9  ;;  %1252 = vmatpush3.bf16.msra.mxu1 %v1485_v31  ;;  %v337_v49 = vpack.c.bf16 %v307_v46, %v305_v45  ;;  %v340_v50 = vpack.c.bf16 %v312_v48, %v310_v47  ;;  %v311_v52 = vld [vmem:[%s1821_s11 + $0x30] sm:$0xff]  ;;  %v316_v54 = vld [vmem:[%s1821_s11 + $0x58] sm:$0xff]  ;;  %v317_v63 = vld [vmem:[%s1821_s11 + $0x60] sm:$0xff]  ;;  %s1590_s22 = scalar_lea.vmem %s1589_s24, 4096  ;;  %p1591_p6 = scmp.lt.s32.totalorder %s1941_s6, %s1589_s24 }
  0x69   : > { %534 = vmatprep.subr.bf16.mxu0 %v1447_v10  ;;  %1253 = vmatprep.subr.bf16.mxu1 %v1486_v32  ;;  %v339_v55 = vpack.c.bf16 %v311_v52, %v309_v51  ;;  %v342_v56 = vpack.c.bf16 %v316_v54, %v314_v53  ;;  %v315_v58 = vld [vmem:[%s1821_s11 + $0x50] sm:$0xff]  ;;  %v320_v60 = vld [vmem:[%s1821_s11 + $0x78] sm:$0xff]  ;;  %v322_v1 = vld [vmem:[%s1821_s11 + $0x88] sm:$0xff]  ;;  %p1586_p1 = pnand %p1585_p11, %p2005_p10  ;;  %p1592_p12 = scmp.lt.s32.totalorder %s1590_s22, %s1584_s16 }
  0x6a   : > { %v341_v61 = vpack.c.bf16 %v315_v58, %v313_v57  ;;  %v344_v62 = vpack.c.bf16 %v320_v60, %v318_v59  ;;  %v319_v0 = vld [vmem:[%s1821_s11 + $0x70] sm:$0xff]  ;;  %v324_v2 = vld [vmem:[%s1821_s11 + $0x98] sm:$0xff]  ;;  %v321_v5 = vld [vmem:[%s1821_s11 + $0x80] sm:$0xff] }
  0x6b   : > { %v343_v3 = vpack.c.bf16 %v319_v0, %v317_v63  ;;  %v346_v4 = vpack.c.bf16 %v324_v2, %v322_v1  ;;  %v323_v6 = vld [vmem:[%s1821_s11 + $0x90] sm:$0xff]  ;;  %v326_v7 = vld [vmem:[%s1821_s11 + $0xa8] sm:$0xff]  ;;  %v328_v8 = vld [vmem:[%s1821_s11 + $0xb8] sm:$0xff]  ;;  %p1587_p2 = pneg %p1586_p1  ;;  %p1593_p3 = por %p1592_p12, %p1591_p6 }
  0x6c   : > { %535 = vmatpush1.bf16.msra.mxu0 %v1449_v11  ;;  %1254 = vmatpush3.bf16.msra.mxu1 %v1487_v35  ;;  %v345_v9 = vpack.c.bf16 %v323_v6, %v321_v5  ;;  %v348_v10 = vpack.c.bf16 %v328_v8, %v326_v7  ;;  %v325_v11 = vld [vmem:[%s1821_s11 + $0xa0] sm:$0xff]  ;;  %v330_v13 = vld [vmem:[%s1821_s11 + $0xc8] sm:$0xff]  ;;  %v332_v14 = vld [vmem:[%s1821_s11 + $0xd8] sm:$0xff] }
  0x6d   : > { %536 = vmatprep.subr.bf16.mxu0 %v1450_v12  ;;  %1255 = vmatprep.subr.bf16.mxu1 %v1488_v36  ;;  %v327_v12 = vld [vmem:[%s1821_s11 + $0xb0] sm:$0xff]  ;;  %v1490_v26 = vld [vmem:[#allocation5 + $0x1a0] ss:$8 sps:$4 sm:$0xff]   ;;  %p1594_p9 = pnand %p1593_p3, %p1587_p2 }
  0x6e   : > { %v347_v15 = vpack.c.bf16 %v327_v12, %v325_v11  ;;  %v335_v24 = vld [vmem:[%s1821_s11 + $0xf0] sm:$0xff]  ;;  %v1491_v27 = vld [vmem:[#allocation5 + $0x120] ss:$8 sps:$4 sm:$0xff]  }
  0x6f   : > { %v1492_v28 = vld [vmem:[#allocation5 + $0x190] ss:$8 sps:$4 sm:$0xff]   ;;  %v1495_v31 = vld [vmem:[#allocation5 + $0x100] ss:$8 sps:$4 sm:$0xff]  }
  0x70   : > { %537 = vmatpush1.bf16.msra.mxu0 %v1452_v16  ;;  %1256 = vmatpush3.bf16.msra.mxu1 %v1489_v38  ;;  %v350_v16 = vpack.c.bf16 %v332_v14, %v330_v13  ;;  %v1496_v32 = vld [vmem:[#allocation5 + $0x270] ss:$8 sps:$4 sm:$0xff]   ;;  %v1497_v57 = vld [vmem:[#allocation5 + $0x260] ss:$8 sps:$4 sm:$0xff]  }
  0x71   : > { %538 = vmatprep.subr.bf16.mxu0 %v1453_v17  ;;  %v329_v17 = vld [vmem:[%s1821_s11 + $0xc0] sm:$0xff]  ;;  %1257 = vmatprep.subr.bf16.mxu1 %v1490_v26  ;;  %v1498_v1 = vld [vmem:[#allocation5 + $0x250] ss:$8 sps:$4 sm:$0xff]  }
  0x74   : > { %539 = vmatpush1.bf16.msra.mxu0 %v1455_v18  ;;  %v331_v18 = vld [vmem:[%s1821_s11 + $0xd0] sm:$0xff]  ;;  %1258 = vmatpush3.bf16.msra.mxu1 %v1491_v27 }
  0x75   : > { %540 = vmatprep.subr.bf16.mxu0 %v1456_v19  ;;  %v334_v19 = vld [vmem:[%s1821_s11 + $0xe8] sm:$0xff]  ;;  %1259 = vmatprep.subr.bf16.mxu1 %v1492_v28 }
  0x78   : > { %541 = vmatpush2.bf16.msra.mxu0 %v1458_v20  ;;  %v336_v20 = vld [vmem:[%s1821_s11 + $0xf8] sm:$0xff] }
  0x79   : > { %542 = vmatprep.subr.bf16.mxu0 %v1459_v21  ;;  %v349_v21 = vpack.c.bf16 %v331_v18, %v329_v17  ;;  %v352_v22 = vpack.c.bf16 %v336_v20, %v334_v19 }
  0x7c   : > { %543 = vmatpush2.bf16.msra.mxu0 %v1461_v23  ;;  %v333_v23 = vld [vmem:[%s1821_s11 + $0xe0] sm:$0xff] }
  0x7d   : > { %544 = vmatprep.subr.bf16.mxu0 %v1462_v25  ;;  %v351_v25 = vpack.c.bf16 %v335_v24, %v333_v23 }
  0x80   : > { %545 = vmatpush2.bf16.msra.mxu0 %v1464_v29  ;;  %v1493_v29 = vld [vmem:[#allocation5 + $0x110] ss:$8 sps:$4 sm:$0xff]  }
  0x81   : > { %546 = vmatprep.subr.bf16.mxu0 %v1465_v30  ;;  %1260 = vmatpush3.bf16.msra.mxu1 %v1493_v29  ;;  %v1494_v30 = vld [vmem:[#allocation5 + $0x180] ss:$8 sps:$4 sm:$0xff]  }
  0x82   : > { %1261 = vmatprep.subr.bf16.mxu1 %v1494_v30 }
  0x84   : > { %547 = vmatpush2.bf16.msra.mxu0 %v1467_v33  ;;  %v354_v33 = vlaneseq }
  0x85   : > { %548 = vmatprep.subr.bf16.mxu0 %v1468_v34  ;;  %1262 = vmatpush3.bf16.msra.mxu1 %v1495_v31 }
  0x86   : > { %1327 = vmatprep.subr.bf16.mxu1 %v1496_v32  ;;  %v355_v34 = vshrl.u32 %v354_v33, 7 }
  0x88   : > { %549 = vmatpush2.bf16.msra.mxu0 %v1470_v37  ;;  %v360_v35 = vsub.s32 1, %v355_v34  ;;  %v356_v36 = vsub.s32 0, %v355_v34  ;;  %v302_v37 = vld [vmem:[#allocation7] ss:$8 sm:$0x3] }
  0x89   : > { %550 = vmatprep.subr.bf16.mxu0 %v1471_v39 }
  0x8a   : > { %v1863_v39 = vrot.slane %v302_v37, %v360_v35 }
  0x8c   : > { %551 = vmatpush2.bf16.msra.mxu0 %v1473_v40  ;;  %v1865_v40 = vrot.slane %v302_v37, %v356_v36 }
  0x8d   : > { %552 = vmatprep.subr.bf16.mxu0 %v1474_v41 }
  0x90   : > { %553 = vmatpush2.bf16.msra.mxu0 %v1476_v42 }
  0x91   : > { %554 = vmatprep.subr.bf16.mxu0 %v1477_v43 }
  0x94   : > { %555 = vmatpush2.bf16.msra.mxu0 %v1479_v44 }
  0x97   : > { %557 = vmatmul.mubr.bf16.vlgmr.msra.gmra.mxu0 %v337_v49 }
  0x98   : > { %566 = vmatprep.mubr.bf16.mxu0 %v340_v50 }
  0x9f   : > { %567 = vmatmul.mubr.bf16.gmra.mxu0 %v339_v55 }
  0xa0   : > { %576 = vmatprep.mubr.bf16.mxu0 %v342_v56 }
  0xa7   : > { %577 = vmatmul.mubr.bf16.gmra.mxu0 %v341_v61 }
  0xa8   : > { %586 = vmatprep.mubr.bf16.mxu0 %v344_v62 }
  0xaf   : > { %587 = vmatmul.mubr.bf16.gmra.mxu0 %v343_v3 }
  0xb0   : > { %596 = vmatprep.mubr.bf16.mxu0 %v346_v4 }
  0xb7   : > { %597 = vmatmul.mubr.bf16.gmra.mxu0 %v345_v9 }
  0xb8   : > { %606 = vmatprep.mubr.bf16.mxu0 %v348_v10 }
  0xbf   : > { %607 = vmatmul.mubr.bf16.gmra.mxu0 %v347_v15 }
  0xc0   : > { %616 = vmatprep.mubr.bf16.mxu0 %v350_v16 }
  0xc7   : > { %617 = vmatmul.mubr.bf16.gmra.mxu0 %v349_v21 }
  0xc8   : > { %626 = vmatprep.mubr.bf16.mxu0 %v352_v22 }
  0xcf   : > { %627 = vmatmul.mubr.bf16.gmra.mxu0 %v351_v25 }
 0x157   : > { %v558_v38 = vpop.f32.mrf.mxu0 }
 0x158   : > { %v559_v45 = vadd.f32 %v558_v38, %v1865_v40 }
 0x159   : > { %v560_v41 = vpop.f32.mrf.mxu0 }
 0x15a   : > { %v561_v43 = vadd.f32 %v560_v41, %v1863_v39  ;;  %v637_v52 = vmax.f32 %v559_v45, 0.0 }
 0x15b   : > { %v562_v42 = vpop.f32.mrf.mxu0 }
 0x15c   : > { %v563_v44 = vadd.f32 %v562_v42, %v1865_v40  ;;  %v638_v50 = vmax.f32 %v561_v43, 0.0 }
 0x15d   : > { %v564_v46 = vpop.f32.mrf.mxu0 }
 0x15e   : > { %v565_v47 = vadd.f32 %v564_v46, %v1863_v39  ;;  %v639_v48 = vmax.f32 %v563_v44, 0.0 }
 0x15f   : > { %v568_v49 = vpop.f32.mrf.mxu0 }
 0x160   : > { %v640_v51 = vmax.f32 %v565_v47, 0.0  ;;  %v669_v55 = vpack.c.bf16 %v639_v48, %v637_v52  ;;  %v569_v60 = vadd.f32 %v568_v49, %v1865_v40 }
 0x161   : > { %v570_v53 = vpop.f32.mrf.mxu0 }
 0x162   : > { %v670_v54 = vpack.c.bf16 %v640_v51, %v638_v50  ;;  %v571_v58 = vadd.f32 %v570_v53, %v1863_v39  ;;  %v641_v4 = vmax.f32 %v569_v60, 0.0 }
 0x163   : > { %v572_v56 = vpop.f32.mrf.mxu0 }
 0x164   : > { %v573_v59 = vadd.f32 %v572_v56, %v1865_v40  ;;  %813 = vmatprep.mubr.bf16.mxu1 %v670_v54  ;;  %v642_v2 = vmax.f32 %v571_v58, 0.0 }
 0x165   : > { %v574_v61 = vpop.f32.mrf.mxu0  ;;  %814 = vmatmul.mubr.bf16.vlgmr.msra.gmra.mxu1 %v669_v55 }
 0x166   : > { %v575_v62 = vadd.f32 %v574_v61, %v1863_v39  ;;  %1328 = vmatpush3.bf16.msra.mxu1 %v1496_v32  ;;  %v643_v63 = vmax.f32 %v573_v59, 0.0 }
 0x167   : > { %v578_v0 = vpop.f32.mrf.mxu0  ;;  %1329 = vmatprep.subr.bf16.mxu1 %v1497_v57 }
 0x168   : > { %v644_v3 = vmax.f32 %v575_v62, 0.0  ;;  %v671_v7 = vpack.c.bf16 %v643_v63, %v641_v4  ;;  %v579_v11 = vadd.f32 %v578_v0, %v1865_v40 }
 0x169   : > { %v580_v5 = vpop.f32.mrf.mxu0 }
 0x16a   : > { %v672_v6 = vpack.c.bf16 %v644_v3, %v642_v2  ;;  %1330 = vmatpush3.bf16.msra.mxu1 %v1497_v57  ;;  %v581_v9 = vadd.f32 %v580_v5, %v1863_v39  ;;  %v645_v18 = vmax.f32 %v579_v11, 0.0 }
 0x16b   : > { %v582_v8 = vpop.f32.mrf.mxu0  ;;  %1331 = vmatprep.subr.bf16.mxu1 %v1498_v1 }
 0x16c   : > { %v583_v10 = vadd.f32 %v582_v8, %v1865_v40  ;;  %821 = vmatprep.mubr.bf16.mxu1 %v672_v6  ;;  %v646_v16 = vmax.f32 %v581_v9, 0.0 }
 0x16d   : > { %v584_v12 = vpop.f32.mrf.mxu0  ;;  %822 = vmatmul.mubr.bf16.gmra.mxu1 %v671_v7 }
 0x16e   : > { %v585_v13 = vadd.f32 %v584_v12, %v1863_v39  ;;  %1332 = vmatpush3.bf16.msra.mxu1 %v1498_v1  ;;  %v647_v14 = vmax.f32 %v583_v10, 0.0 }
 0x16f   : > { %v588_v15 = vpop.f32.mrf.mxu0 }
 0x170   : > { %v648_v17 = vmax.f32 %v585_v13, 0.0  ;;  %v673_v21 = vpack.c.bf16 %v647_v14, %v645_v18  ;;  %v589_v25 = vadd.f32 %v588_v15, %v1865_v40 }
 0x171   : > { %v590_v19 = vpop.f32.mrf.mxu0 }
 0x172   : > { %v674_v20 = vpack.c.bf16 %v648_v17, %v646_v16  ;;  %v591_v23 = vadd.f32 %v590_v19, %v1863_v39  ;;  %v649_v32 = vmax.f32 %v589_v25, 0.0 }
 0x173   : > { %v592_v22 = vpop.f32.mrf.mxu0 }
 0x174   : > { %v593_v24 = vadd.f32 %v592_v22, %v1865_v40  ;;  %829 = vmatprep.mubr.bf16.mxu1 %v674_v20  ;;  %v650_v30 = vmax.f32 %v591_v23, 0.0 }
 0x175   : > { %v594_v26 = vpop.f32.mrf.mxu0  ;;  %830 = vmatmul.mubr.bf16.gmra.mxu1 %v673_v21 }
 0x176   : > { %v595_v27 = vadd.f32 %v594_v26, %v1863_v39  ;;  %v651_v28 = vmax.f32 %v593_v24, 0.0 }
 0x177   : > { %v598_v29 = vpop.f32.mrf.mxu0 }
 0x178   : > { %v652_v31 = vmax.f32 %v595_v27, 0.0  ;;  %v675_v35 = vpack.c.bf16 %v651_v28, %v649_v32  ;;  %v599_v41 = vadd.f32 %v598_v29, %v1865_v40  ;;  %v1499_v28 = vld [vmem:[#allocation5 + $0x240] ss:$8 sps:$4 sm:$0xff]   ;;  %v1500_v29 = vld [vmem:[#allocation5 + $0x230] ss:$8 sps:$4 sm:$0xff]  }
 0x179   : > { %v600_v33 = vpop.f32.mrf.mxu0  ;;  %1333 = vmatprep.subr.bf16.mxu1 %v1499_v28 }
 0x17a   : > { %v676_v34 = vpack.c.bf16 %v652_v31, %v650_v30  ;;  %v601_v37 = vadd.f32 %v600_v33, %v1863_v39  ;;  %v653_v48 = vmax.f32 %v599_v41, 0.0  ;;  %1334 = vmatpush3.bf16.msra.mxu1 %v1499_v28  ;;  %v1501_v30 = vld [vmem:[#allocation5 + $0x220] ss:$8 sps:$4 sm:$0xff]  }
 0x17b   : > { %v602_v36 = vpop.f32.mrf.mxu0  ;;  %1335 = vmatprep.subr.bf16.mxu1 %v1500_v29 }
 0x17c   : > { %v603_v38 = vadd.f32 %v602_v36, %v1865_v40  ;;  %837 = vmatprep.mubr.bf16.mxu1 %v676_v34  ;;  %v654_v46 = vmax.f32 %v601_v37, 0.0  ;;  %v1899_v34 = vld [vmem:[#allocation7 + $0x10] ss:$0 sm:$0xff] }
 0x17d   : > { %v604_v42 = vpop.f32.mrf.mxu0  ;;  %838 = vmatmul.mubr.bf16.gmra.mxu1 %v675_v35 }
 0x17e   : > { %v605_v43 = vadd.f32 %v604_v42, %v1863_v39  ;;  %v655_v44 = vmax.f32 %v603_v38, 0.0  ;;  %1336 = vmatpush3.bf16.msra.mxu1 %v1500_v29 }
 0x17f   : > { %v608_v45 = vpop.f32.mrf.mxu0  ;;  %1337 = vmatprep.subr.bf16.mxu1 %v1501_v30 }
 0x180   : > { %v656_v47 = vmax.f32 %v605_v43, 0.0  ;;  %v677_v51 = vpack.c.bf16 %v655_v44, %v653_v48  ;;  %v609_v55 = vadd.f32 %v608_v45, %v1865_v40 }
 0x181   : > { %v610_v49 = vpop.f32.mrf.mxu0 }
 0x182   : > { %v678_v50 = vpack.c.bf16 %v656_v47, %v654_v46  ;;  %v611_v53 = vadd.f32 %v610_v49, %v1863_v39  ;;  %v657_v62 = vmax.f32 %v609_v55, 0.0  ;;  %1338 = vmatpush3.bf16.msra.mxu1 %v1501_v30 }
 0x183   : > { %v612_v52 = vpop.f32.mrf.mxu0 }
 0x184   : > { %v613_v54 = vadd.f32 %v612_v52, %v1865_v40  ;;  %845 = vmatprep.mubr.bf16.mxu1 %v678_v50  ;;  %v658_v60 = vmax.f32 %v611_v53, 0.0 }
 0x185   : > { %v614_v56 = vpop.f32.mrf.mxu0  ;;  %846 = vmatmul.mubr.bf16.gmra.mxu1 %v677_v51 }
 0x186   : > { %v615_v57 = vadd.f32 %v614_v56, %v1863_v39  ;;  %v659_v58 = vmax.f32 %v613_v54, 0.0 }
 0x187   : > { %v618_v59 = vpop.f32.mrf.mxu0 }
 0x188   : > { %v660_v61 = vmax.f32 %v615_v57, 0.0  ;;  %v679_v1 = vpack.c.bf16 %v659_v58, %v657_v62  ;;  %v619_v5 = vadd.f32 %v618_v59, %v1865_v40 }
 0x189   : > { %v620_v63 = vpop.f32.mrf.mxu0 }
 0x18a   : > { %v680_v0 = vpack.c.bf16 %v660_v61, %v658_v60  ;;  %v621_v3 = vadd.f32 %v620_v63, %v1863_v39  ;;  %v661_v12 = vmax.f32 %v619_v5, 0.0 }
 0x18b   : > { %v622_v2 = vpop.f32.mrf.mxu0 }
 0x18c   : > { %v623_v4 = vadd.f32 %v622_v2, %v1865_v40  ;;  %853 = vmatprep.mubr.bf16.mxu1 %v680_v0  ;;  %v662_v10 = vmax.f32 %v621_v3, 0.0 }
 0x18d   : > { %v624_v6 = vpop.f32.mrf.mxu0  ;;  %854 = vmatmul.mubr.bf16.gmra.mxu1 %v679_v1 }
 0x18e   : > { %v625_v7 = vadd.f32 %v624_v6, %v1863_v39  ;;  %v663_v8 = vmax.f32 %v623_v4, 0.0 }
 0x18f   : > { %v628_v9 = vpop.f32.mrf.mxu0 }
 0x190   : > { %v664_v11 = vmax.f32 %v625_v7, 0.0  ;;  %v681_v15 = vpack.c.bf16 %v663_v8, %v661_v12  ;;  %v629_v19 = vadd.f32 %v628_v9, %v1865_v40 }
 0x191   : > { %v630_v13 = vpop.f32.mrf.mxu0 }
 0x192   : > { %v682_v14 = vpack.c.bf16 %v664_v11, %v662_v10  ;;  %v631_v17 = vadd.f32 %v630_v13, %v1863_v39  ;;  %v665_v25 = vmax.f32 %v629_v19, 0.0 }
 0x193   : > { %v632_v16 = vpop.f32.mrf.mxu0 }
 0x194   : > { %v633_v18 = vadd.f32 %v632_v16, %v1865_v40  ;;  %861 = vmatprep.mubr.bf16.mxu1 %v682_v14  ;;  %v666_v23 = vmax.f32 %v631_v17, 0.0  ;;  %v1502_v40 = vld [vmem:[#allocation5 + $0x210] ss:$8 sps:$4 sm:$0xff]  }
 0x195   : > { %v634_v20 = vpop.f32.mrf.mxu0  ;;  %862 = vmatmul.mubr.bf16.gmra.mxu1 %v681_v15  ;;  %1339 = vmatprep.subr.bf16.mxu1 %v1502_v40 }
 0x196   : > { %v635_v21 = vadd.f32 %v634_v20, %v1863_v39  ;;  %v667_v22 = vmax.f32 %v633_v18, 0.0  ;;  %1340 = vmatpush3.bf16.msra.mxu1 %v1502_v40  ;;  %v1503_v39 = vld [vmem:[#allocation5 + $0x200] ss:$8 sps:$4 sm:$0xff]  }
 0x197   : > { %1341 = vmatprep.subr.bf16.mxu1 %v1503_v39 }
 0x198   : > { %v668_v24 = vmax.f32 %v635_v21, 0.0  ;;  %v683_v27 = vpack.c.bf16 %v667_v22, %v665_v25 }
 0x19a   : > { %v684_v26 = vpack.c.bf16 %v668_v24, %v666_v23  ;;  %1342 = vmatpush3.bf16.msra.mxu1 %v1503_v39 }
 0x19c   : > { %869 = vmatprep.mubr.bf16.mxu1 %v684_v26 }
 0x19d   : > { %870 = vmatmul.mubr.bf16.gmra.mxu1 %v683_v27 }
 0x225   : > { %v1263_v31 = vpop.f32.mrf.mxu1 }
 0x227   : > { %v1264_v32 = vpop.f32.mrf.mxu1 }
 0x228   : > { %v1265_v33 = vadd.f32 %v1264_v32, %v1263_v31 }
 0x229   : > { %v1266_v35 = vpop.f32.mrf.mxu1 }
 0x22a   : > { %v816_v37 = vadd.f32 %v1265_v33, %v1899_v34 }
 0x22b   : > { %v1267_v36 = vpop.f32.mrf.mxu1 }
 0x22c   : > { %v1268_v38 = vadd.f32 %v1267_v36, %v1266_v35  ;;  %v878_v44 = vmax.f32 %v816_v37, 0.0 }
 0x22d   : > { %v1269_v41 = vpop.f32.mrf.mxu1 }
 0x22e   : > { %v819_v42 = vadd.f32 %v1268_v38, %v1899_v34 }
 0x22f   : > { %v1270_v43 = vpop.f32.mrf.mxu1 }
 0x230   : > { %v879_v45 = vmax.f32 %v819_v42, 0.0  ;;  %v1271_v46 = vadd.f32 %v1270_v43, %v1269_v41 }
 0x231   : > { %v1272_v47 = vpop.f32.mrf.mxu1 }
 0x232   : > { %v894_v48 = vpack.c.bf16 %v879_v45, %v878_v44  ;;  %v824_v50 = vadd.f32 %v1271_v46, %v1899_v34 }
 0x233   : > { %v1273_v49 = vpop.f32.mrf.mxu1 }
 0x234   : > { %v1274_v51 = vadd.f32 %v1273_v49, %v1272_v47  ;;  %1343 = vmatprep.mubr.bf16.mxu1 %v894_v48  ;;  %v880_v55 = vmax.f32 %v824_v50, 0.0 }
 0x235   : > { %v1275_v52 = vpop.f32.mrf.mxu1 }
 0x236   : > { %v827_v53 = vadd.f32 %v1274_v51, %v1899_v34 }
 0x237   : > { %v1276_v54 = vpop.f32.mrf.mxu1 }
 0x238   : > { %v881_v56 = vmax.f32 %v827_v53, 0.0  ;;  %v1277_v57 = vadd.f32 %v1276_v54, %v1275_v52 }
 0x239   : > { %v1278_v58 = vpop.f32.mrf.mxu1 }
 0x23a   : > { %v895_v59 = vpack.c.bf16 %v881_v56, %v880_v55  ;;  %v832_v61 = vadd.f32 %v1277_v57, %v1899_v34 }
 0x23b   : > { %v1279_v60 = vpop.f32.mrf.mxu1 }
 0x23c   : > { %v1280_v62 = vadd.f32 %v1279_v60, %v1278_v58  ;;  %1344 = vmatmul.mubr.bf16.vlgmr.msra.gmra.mxu1 %v895_v59  ;;  %v882_v2 = vmax.f32 %v832_v61, 0.0  ;;  %v304_v59 = vld [vmem:[#allocation7 + $0x20] ss:$0 sm:$0xff] }
 0x23d   : > { %v1281_v63 = vpop.f32.mrf.mxu1 }
 0x23e   : > { %v835_v0 = vadd.f32 %v1280_v62, %v1899_v34 }
 0x23f   : > { %v1282_v1 = vpop.f32.mrf.mxu1 }
 0x240   : > { %v883_v3 = vmax.f32 %v835_v0, 0.0  ;;  %v1283_v4 = vadd.f32 %v1282_v1, %v1281_v63 }
 0x241   : > { %v1284_v5 = vpop.f32.mrf.mxu1 }
 0x242   : > { %v896_v6 = vpack.c.bf16 %v883_v3, %v882_v2  ;;  %v840_v8 = vadd.f32 %v1283_v4, %v1899_v34 }
 0x243   : > { %v1285_v7 = vpop.f32.mrf.mxu1 }
 0x244   : > { %v1286_v9 = vadd.f32 %v1285_v7, %v1284_v5  ;;  %1347 = vmatprep.mubr.bf16.mxu1 %v896_v6  ;;  %v884_v13 = vmax.f32 %v840_v8, 0.0 }
 0x245   : > { %v1287_v10 = vpop.f32.mrf.mxu1 }
 0x246   : > { %v843_v11 = vadd.f32 %v1286_v9, %v1899_v34 }
 0x247   : > { %v1288_v12 = vpop.f32.mrf.mxu1 }
 0x248   : > { %v885_v14 = vmax.f32 %v843_v11, 0.0  ;;  %v1289_v15 = vadd.f32 %v1288_v12, %v1287_v10 }
 0x249   : > { %v1290_v16 = vpop.f32.mrf.mxu1 }
 0x24a   : > { %v897_v17 = vpack.c.bf16 %v885_v14, %v884_v13  ;;  %v848_v19 = vadd.f32 %v1289_v15, %v1899_v34 }
 0x24b   : > { %v1291_v18 = vpop.f32.mrf.mxu1 }
 0x24c   : > { %v1292_v20 = vadd.f32 %v1291_v18, %v1290_v16  ;;  %1348 = vmatmul.mubr.bf16.gmra.mxu1 %v897_v17  ;;  %v886_v24 = vmax.f32 %v848_v19, 0.0 }
 0x24d   : > { %v1293_v21 = vpop.f32.mrf.mxu1 }
 0x24e   : > { %v851_v22 = vadd.f32 %v1292_v20, %v1899_v34 }
 0x24f   : > { %v1294_v23 = vpop.f32.mrf.mxu1 }
 0x250   : > { %v887_v25 = vmax.f32 %v851_v22, 0.0  ;;  %v1295_v26 = vadd.f32 %v1294_v23, %v1293_v21 }
 0x251   : > { %v1296_v27 = vpop.f32.mrf.mxu1 }
 0x252   : > { %v898_v28 = vpack.c.bf16 %v887_v25, %v886_v24  ;;  %v856_v30 = vadd.f32 %v1295_v26, %v1899_v34 }
 0x253   : > { %v1297_v29 = vpop.f32.mrf.mxu1 }
 0x254   : > { %v1298_v40 = vadd.f32 %v1297_v29, %v1296_v27  ;;  %1351 = vmatprep.mubr.bf16.mxu1 %v898_v28  ;;  %v888_v33 = vmax.f32 %v856_v30, 0.0 }
 0x255   : > { %v1299_v39 = vpop.f32.mrf.mxu1 }
 0x256   : > { %v859_v31 = vadd.f32 %v1298_v40, %v1899_v34 }
 0x257   : > { %v1300_v32 = vpop.f32.mrf.mxu1 }
 0x258   : > { %v889_v35 = vmax.f32 %v859_v31, 0.0  ;;  %v1301_v36 = vadd.f32 %v1300_v32, %v1299_v39 }
 0x259   : > { %v1302_v37 = vpop.f32.mrf.mxu1 }
 0x25a   : > { %v899_v38 = vpack.c.bf16 %v889_v35, %v888_v33  ;;  %v864_v42 = vadd.f32 %v1301_v36, %v1899_v34 }
 0x25b   : > { %v1303_v41 = vpop.f32.mrf.mxu1 }
 0x25c   : > { %v1304_v43 = vadd.f32 %v1303_v41, %v1302_v37  ;;  %1352 = vmatmul.mubr.bf16.gmra.mxu1 %v899_v38  ;;  %v890_v47 = vmax.f32 %v864_v42, 0.0 }
 0x25d   : > { %v1305_v44 = vpop.f32.mrf.mxu1 }
 0x25e   : > { %v867_v45 = vadd.f32 %v1304_v43, %v1899_v34 }
 0x25f   : > { %v1306_v46 = vpop.f32.mrf.mxu1 }
 0x260   : > { %v891_v48 = vmax.f32 %v867_v45, 0.0  ;;  %v1307_v49 = vadd.f32 %v1306_v46, %v1305_v44 }
 0x261   : > { %v1308_v50 = vpop.f32.mrf.mxu1 }
 0x262   : > { %v900_v51 = vpack.c.bf16 %v891_v48, %v890_v47  ;;  %v872_v53 = vadd.f32 %v1307_v49, %v1899_v34 }
 0x263   : > { %v1309_v52 = vpop.f32.mrf.mxu1 }
 0x264   : > { %v1310_v54 = vadd.f32 %v1309_v52, %v1308_v50  ;;  %1355 = vmatprep.mubr.bf16.mxu1 %v900_v51  ;;  %v892_v56 = vmax.f32 %v872_v53, 0.0 }
 0x266   : > { %v875_v55 = vadd.f32 %v1310_v54, %v1899_v34 }
 0x268   : > { %v893_v57 = vmax.f32 %v875_v55, 0.0 }
 0x26a   : > { %v901_v58 = vpack.c.bf16 %v893_v57, %v892_v56 }
 0x26c   : > { %1356 = vmatmul.mubr.bf16.gmra.mxu1 %v901_v58 }
 0x2fc   : > { %v1345_v60 = vpop.f32.mrf.mxu1 }
 0x2fd   : > { %v993_v61 = vadd.f32 %v1345_v60, %v304_v59 }
 0x2fe   : > { %v984_v62 = vpop.f32.mrf.mxu1 }
 0x2ff   : > { %1049 = vst [vmem:[%s1918_s20 + $0x10] sm:$0xff] %v993_v61  ;;  %v985_v63 = vadd.f32 %v984_v62, %v304_v59 }
 0x300   : > { %v1346_v34 = vpop.f32.mrf.mxu1 }
 0x301   : > { %1047 = vst [vmem:[%s1918_s20] sm:$0xff] %v985_v63  ;;  %v996_v0 = vadd.f32 %v1346_v34, %v304_v59 }
 0x302   : > { %v987_v1 = vpop.f32.mrf.mxu1 }
 0x303   : > { %1050 = vst [vmem:[%s1918_s20 + $0x18] sm:$0xff] %v996_v0  ;;  %v988_v2 = vadd.f32 %v987_v1, %v304_v59 }
 0x305   : > { %1048 = vst [vmem:[%s1918_s20 + $0x8] sm:$0xff] %v988_v2 }
 0x30c   : > { %v1349_v3 = vpop.f32.mrf.mxu1 }
 0x30d   : > { %v1009_v4 = vadd.f32 %v1349_v3, %v304_v59 }
 0x30e   : > { %v1000_v5 = vpop.f32.mrf.mxu1 }
 0x30f   : > { %1053 = vst [vmem:[%s1918_s20 + $0x30] sm:$0xff] %v1009_v4  ;;  %v1001_v6 = vadd.f32 %v1000_v5, %v304_v59 }
 0x310   : > { %v1350_v7 = vpop.f32.mrf.mxu1 }
 0x311   : > { %1051 = vst [vmem:[%s1918_s20 + $0x20] sm:$0xff] %v1001_v6  ;;  %v1012_v8 = vadd.f32 %v1350_v7, %v304_v59 }
 0x312   : > { %v1003_v9 = vpop.f32.mrf.mxu1 }
 0x313   : > { %1054 = vst [vmem:[%s1918_s20 + $0x38] sm:$0xff] %v1012_v8  ;;  %v1004_v10 = vadd.f32 %v1003_v9, %v304_v59 }
 0x315   : > { %1052 = vst [vmem:[%s1918_s20 + $0x28] sm:$0xff] %v1004_v10 }
 0x31c   : > { %v1353_v11 = vpop.f32.mrf.mxu1 }
 0x31d   : > { %v1025_v12 = vadd.f32 %v1353_v11, %v304_v59 }
 0x31e   : > { %v1016_v13 = vpop.f32.mrf.mxu1 }
 0x31f   : > { %1057 = vst [vmem:[%s1918_s20 + $0x50] sm:$0xff] %v1025_v12  ;;  %v1017_v14 = vadd.f32 %v1016_v13, %v304_v59 }
 0x320   : > { %v1354_v15 = vpop.f32.mrf.mxu1 }
 0x321   : > { %1055 = vst [vmem:[%s1918_s20 + $0x40] sm:$0xff] %v1017_v14  ;;  %v1028_v16 = vadd.f32 %v1354_v15, %v304_v59 }
 0x322   : > { %v1019_v17 = vpop.f32.mrf.mxu1 }
 0x323   : > { %1058 = vst [vmem:[%s1918_s20 + $0x58] sm:$0xff] %v1028_v16  ;;  %v1020_v18 = vadd.f32 %v1019_v17, %v304_v59 }
 0x325   : > { %1056 = vst [vmem:[%s1918_s20 + $0x48] sm:$0xff] %v1020_v18 }
 0x32c   : > { %v1357_v19 = vpop.f32.mrf.mxu1 }
 0x32d   : > { %v1041_v20 = vadd.f32 %v1357_v19, %v304_v59 }
 0x32e   : > { %v1032_v21 = vpop.f32.mrf.mxu1 }
 0x32f   : > { %1061 = vst [vmem:[%s1918_s20 + $0x70] sm:$0xff] %v1041_v20  ;;  %v1033_v22 = vadd.f32 %v1032_v21, %v304_v59 }
 0x330   : > { %v1358_v23 = vpop.f32.mrf.mxu1 }
 0x331   : > { %1059 = vst [vmem:[%s1918_s20 + $0x60] sm:$0xff] %v1033_v22  ;;  %v1044_v24 = vadd.f32 %v1358_v23, %v304_v59 }
 0x332   : > { %v1035_v25 = vpop.f32.mrf.mxu1 }
 0x333   : > { %1062 = vst [vmem:[%s1918_s20 + $0x78] sm:$0xff] %v1044_v24  ;;  %v1036_v26 = vadd.f32 %v1035_v25, %v304_v59 }
 0x335   : > { %1060 = vst [vmem:[%s1918_s20 + $0x68] sm:$0xff] %v1036_v26 }
 0x336   : > { %1597 = shalt.err (!%p1594_p9)
}
 0x337   : > { %s1598_s25 = scalar_lea.hbm %s1939_s30, 2048  ;;  %s1602_s8 = scalar_lea.hbm %s1989_s3, 4096 }
 0x338   : > { %p1599_p13 = scmp.ne.s32.totalorder %s1939_s30, %s1598_s25  ;;  %p1603_p4 = scmp.lt.s32.totalorder %s1939_s30, %s1989_s3 }
 0x339   : > { %p1604_p8 = scmp.lt.s32.totalorder %s1602_s8, %s1598_s25 }
 0x33a   : > { %p1600_p5 = pnand %p1599_p13, %p2005_p10 }
 0x33b   : > { %p1605_p7 = por %p1604_p8, %p1603_p4 }
 0x33c   : > { %p1601_p0 = pneg %p1600_p5 }
 0x33e   : > { %p1606_p11 = pnand %p1605_p7, %p1601_p0 }
 0x340   : > { %1609 = shalt.err (!%p1606_p11)
}
 0x341   : > { %s1662_s18 = smov 128   ;;  %s1663_s20 = smov 8  }
 0x342   : > { %1369 = dma.vmem_to_hbm [thread:$0]  (%p2005_p10), %s1941_s6, 2048, %s1939_s30, %s1064_s4, %s1662_s18, %s1662_s18, %s1663_s20  }
 0x343 PF: > { %s1092_s5 = sand.u32 1, %s1640_s12   ;;  %p2006_p1 = scmp.ne.s32.totalorder %s1995_s19, 0 }
 0x344   : > { %p2007_p2 = scmp.ge.s32.totalorder %s1652_s15, 2  ;;  %s1093_s27 = scalar_lea.sflag [#allocation4], %s1092_s5 }
 0x346   : > { %p1383_p6 = pnand %p2007_p2, %p2006_p1 }
 0x348   : > { %p1384_p12 = pneg %p1383_p6 }
 0x34a   : > { %1635 = dma.done.wait (%p1384_p12), %s1093_s27, 2048  }
 0x34b   : > { %1637 = vsyncadd (%p1384_p12), %s1093_s27, 4294965248  ;;  %p17_p3 = scmp.ge.s32.totalorder %s1759_s9, 4   ;;  %s2008_s12 = smov %s1644_s13 }
 0x34c   : > { %s2009_s13 = smov %s1648_s14  ;;  %s2010_s14 = smov %s1768_s17 }
 0x34d   : > { %s2011_s15 = smov %s1759_s9  ;;  %19 = sbr.rel (!%p17_p3) target bundleno = 6 (0x6), region = 85 }
 0x352   :  { %1098 = vsyncpa [#allocation3], 1 }
 0x353   :  { %1100 = vsyncpa [#allocation3 + $0x1], 1 }
 0x354   :  { %1101 = vsyncpa [#allocation6], 1 }
 0x355   :  { %1102 = vsyncpa [#allocation4], 1 }
 0x356   :  { %1104 = vsyncpa [#allocation4 + $0x1], 1 }

</bundles_post_ra>
